<compile_context>
chip_gen: v7x
topology: tpu7x:2x2x1
jax: 0.10.0
libtpu: 0.0.40
codegen_flags: <defaults>
</compile_context>

<pallas_src>
import jax
import jax.numpy as jnp
from jax import lax
from jax.experimental import pallas as pl
from jax.experimental.pallas import tpu as pltpu


def _round_up(x, m):
    return (x + m - 1) // m * m


_TARGET_EMB_TILE_BYTES = 2 * 1024 * 1024   # ~85%+ of HBM roofline per measured data


def _vmem_limit_bytes(need_bytes):
    """Generation-aware scoped-VMEM limit (v7x: 64 MiB phys, v5e/v6e: 128 MiB)."""
    try:
        phys = int(getattr(pltpu.get_tpu_info(), "vmem_capacity_bytes"))
    except Exception:
        phys = 64 * 1024 * 1024            # assume the smallest (v7x per-TC)
    cap = min(int(0.625 * phys), 96 * 1024 * 1024)   # ~40 MiB v7x, ~80 MiB v5e/v6e
    want = 2 * need_bytes + (2 << 20)
    return int(min(max(want, 32 * 1024 * 1024), cap))


def router_sim_kernel(inv_t_ref, hs_ref, embt_ref, out_ref):
    """One (Bp, TN) tile of logits = cos_sim(hs, emb) * (1/t).

    inv_t_ref : SMEM (1,)  f32   reciprocal temperature
    hs_ref    : VMEM (Bp, D)     CLS hidden state (resident across the grid)
    embt_ref  : VMEM (D, TN)     current N-tile of the transposed embedding table
    out_ref   : VMEM (Bp, TN) f32
    """
    hs = hs_ref[...]
    embt = embt_ref[...]

    # Raw MXU matmul in the canonical (M,K)x(K,N) layout, f32 accumulator.
    acc = lax.dot_general(
        hs, embt,
        dimension_numbers=(((1,), (0,)), ((), ())),
        preferred_element_type=jnp.float32)                       # (Bp, TN)

    # Per-row hidden-state scale (tiny: Bp values), 1/t folded in.
    # Padded rows have zero norm -> scale 0 (no NaNs in VMEM).
    hs_f32 = hs.astype(jnp.float32)
    hs_ss = jnp.sum(hs_f32 * hs_f32, axis=1, keepdims=True)       # (Bp, 1)
    hs_scale = jnp.where(hs_ss > 0.0, lax.rsqrt(hs_ss), 0.0) * inv_t_ref[0]

    # Per-column embedding scale; sublane reduce of the transposed tile gives
    # the (1, TN) norm directly.  Padded (zero) columns -> scale 0.
    embt_f32 = embt.astype(jnp.float32)
    emb_ss = jnp.sum(embt_f32 * embt_f32, axis=0, keepdims=True)  # (1, TN)
    emb_scale = jnp.where(emb_ss > 0.0, lax.rsqrt(emb_ss), 0.0)

    # Scale the small (Bp, TN) output instead of either (.., D) operand.
    out_ref[...] = acc * hs_scale * emb_scale


@jax.jit
def _router_logits(hidden_state, embeddings, inv_t):
    B, D = hidden_state.shape
    N, _ = embeddings.shape

    hs_isz = hidden_state.dtype.itemsize
    emb_isz = embeddings.dtype.itemsize

    # dtype-aware sublane padding of the batch: 8 rows f32 / 16 bf16 / 32 int8.
    row_pack = 8 * max(1, 4 // hs_isz)
    Bp = _round_up(max(B, row_pack), row_pack)

    # TN from a byte budget (lane-dense multiple of 128); keep >= 2 tiles for a
    # large table so the "parallel" grid axis can shard across v7x cores.
    N128 = _round_up(max(N, 128), 128)
    TN = _round_up(max(_TARGET_EMB_TILE_BYTES // (D * emb_isz), 128), 128)
    if N128 > 128:
        TN = min(TN, _round_up((N128 + 1) // 2, 128))
    TN = min(TN, N128)
    Np = _round_up(N128, TN)

    hs_p = hidden_state if Bp == B else jnp.pad(hidden_state, ((0, Bp - B), (0, 0)))
    emb_p = embeddings if Np == N else jnp.pad(embeddings, ((0, Np - N), (0, 0)))
    # Pre-transpose the (parameter) table once -> MXU-canonical (D, Np) layout.
    embt = jnp.transpose(emb_p)                                    # (D, Np)

    grid = (Np // TN,)

    # VMEM footprint: double-buffered emb tile + double-buffered out tile +
    # resident hidden state + f32 temporaries.
    need = (2 * D * TN * emb_isz
            + 2 * Bp * TN * 4
            + Bp * D * hs_isz
            + D * TN * 4 + Bp * TN * 4)
    vmem_bytes = _vmem_limit_bytes(need)

    cost = pl.CostEstimate(
        flops=2 * Bp * Np * D + 2 * (Bp + Np) * D + 2 * Bp * Np,
        transcendentals=Bp * (Np // TN) + Np,
        bytes_accessed=(Bp * D * hs_isz + Np * D * emb_isz + Bp * Np * 4),
    )

    logits_p = pl.pallas_call(
        router_sim_kernel,
        out_shape=jax.ShapeDtypeStruct((Bp, Np), jnp.float32),
        grid_spec=pltpu.PrefetchScalarGridSpec(
            num_scalar_prefetch=0,
            grid=grid,
            in_specs=[
                pl.BlockSpec(memory_space=pltpu.MemorySpace.SMEM),   # 1/t
                pl.BlockSpec((Bp, D), lambda j: (0, 0)),             # hs (resident)
                pl.BlockSpec((D, TN), lambda j: (0, j)),             # emb^T N-tile
            ],
            out_specs=pl.BlockSpec((Bp, TN), lambda j: (0, j)),
        ),
        compiler_params=pltpu.CompilerParams(
            dimension_semantics=("parallel",),
            vmem_limit_bytes=vmem_bytes,
        ),
        cost_estimate=cost,
    )(inv_t, hs_p, embt)

    return logits_p[:B, :N]


def router_forward(last_hidden_state, embeddings, t=1.0):
    """Equivalent of RouterModule.forward given the backbone output.

    Returns (logits, hidden_state), same as the PyTorch module.
    """
    # TODO(synk): the backbone is an opaque external module; its output
    # last_hidden_state is taken as an input here instead of being computed.
    # TODO(synk): for tiny configs (the module's N=3 case) a plain XLA einsum
    # would avoid pallas_call fixed overhead; kept on the Pallas path here so
    # the kernel is exercised end-to-end.
    hidden_state = last_hidden_state[:, 0, :]                      # (B, D)
    inv_t = jnp.asarray([1.0 / t], dtype=jnp.float32)              # scalar recip in wrapper
    logits = _router_logits(hidden_state, embeddings, inv_t)
    return logits, hidden_state


def _reference_forward(last_hidden_state, embeddings, t=1.0):
    hs = last_hidden_state[:, 0, :]
    num = jnp.dot(hs, embeddings.T, precision=jax.lax.Precision.HIGHEST)
    den = (jnp.linalg.norm(hs, axis=1)[:, None]
           * jnp.linalg.norm(embeddings, axis=1)[None, :])
    return num / den / t, hs


if __name__ == "__main__":
    key = jax.random.PRNGKey(0)
    std_dev = 0.78   # nn.Embedding init in the module: normal(mean=0, std=0.78)
    t = 0.7

    # (B, S, D, N): the module's tiny config plus a multi-tile config that
    # exercises N padding and a >1-step "parallel" grid.
    for (B, S, D, N) in [(8, 8, 32, 3), (4, 4, 256, 1000)]:
        key, k_x, k_emb = jax.random.split(key, 3)
        last_hidden_state = jax.random.normal(k_x, (B, S, D), dtype=jnp.float32)
        embeddings = std_dev * jax.random.normal(k_emb, (N, D), dtype=jnp.float32)

        logits, hidden_state = router_forward(last_hidden_state, embeddings, t)
        jax.block_until_ready((logits, hidden_state))

        ref_logits, ref_hs = _reference_forward(last_hidden_state, embeddings, t)
        assert logits.shape == (B, N)
        assert hidden_state.shape == (B, D)
        assert jnp.allclose(logits, ref_logits, atol=1e-3, rtol=1e-3), (
            (B, S, D, N), float(jnp.max(jnp.abs(logits - ref_logits))))
        assert jnp.allclose(hidden_state, ref_hs)

    print("KERNEL_OK")
</pallas_src>

<mosaic_0001>
module attributes {stable_mosaic.version = 11 : i64} {
  func.func @router_sim_kernel(%arg0: i32, %arg1: memref<1xf32, #tpu.memory_space<smem>>, %arg2: memref<8x32xf32, #tpu.memory_space<vmem>>, %arg3: memref<32x128xf32, #tpu.memory_space<vmem>>, %arg4: memref<8x128xf32, #tpu.memory_space<vmem>>) attributes {dimension_semantics = [#tpu.dimension_semantics<parallel>], iteration_bounds = array<i64: 1>, scalar_prefetch = 0 : i64, scratch_operands = 0 : i64, tpu.core_type = #tpu.core_type<tc>, window_params = [{transform_indices = @transform_0, window_bounds = array<i64: 1>}, {pipeline_mode = #tpu.pipeline_mode<synchronous>, transform_indices = @transform_1, window_bounds = array<i64: 8, 32>}, {transform_indices = @transform_2, window_bounds = array<i64: 32, 128>}, {transform_indices = @transform_3, window_bounds = array<i64: 8, 128>}]} {
    %c0 = arith.constant 0 : index
    %c0_0 = arith.constant 0 : index
    %0 = vector.load %arg2[%c0, %c0_0] : memref<8x32xf32, #tpu.memory_space<vmem>>, vector<8x32xf32>
    %c0_1 = arith.constant 0 : index
    %c0_2 = arith.constant 0 : index
    %1 = vector.load %arg3[%c0_1, %c0_2] : memref<32x128xf32, #tpu.memory_space<vmem>>, vector<32x128xf32>
    %cst = arith.constant dense<0.000000e+00> : vector<8x128xf32>
    %2 = tpu.matmul %0, %1, %cst {dimension_numbers = #tpu.dot_dimension_numbers<[1], [0], [0], [1], [0, 0, 1, 1], [], []>} : vector<8x32xf32>, vector<32x128xf32>, vector<8x128xf32> -> vector<8x128xf32>
    %3 = arith.mulf %0, %0 : vector<8x32xf32>
    %cst_3 = arith.constant dense<0.000000e+00> : vector<8xf32>
    %4 = vector.multi_reduction <add>, %3, %cst_3 [1] : vector<8x32xf32> to vector<8xf32>
    %5 = vector.shape_cast %4 : vector<8xf32> to vector<8x1xf32>
    %cst_4 = arith.constant 0.000000e+00 : f32
    %6 = vector.broadcast %cst_4 : f32 to vector<8x1xf32>
    %7 = arith.cmpf ogt, %5, %6 : vector<8x1xf32>
    %8 = math.rsqrt %5 : vector<8x1xf32>
    %cst_5 = arith.constant 0.000000e+00 : f32
    %9 = vector.broadcast %cst_5 : f32 to vector<8x1xf32>
    %10 = arith.select %7, %8, %9 : vector<8x1xi1>, vector<8x1xf32>
    %c0_6 = arith.constant 0 : index
    %11 = memref.load %arg1[%c0_6] : memref<1xf32, #tpu.memory_space<smem>>
    %12 = vector.broadcast %11 : f32 to vector<8x1xf32>
    %13 = arith.mulf %10, %12 : vector<8x1xf32>
    %14 = arith.mulf %1, %1 : vector<32x128xf32>
    %cst_7 = arith.constant dense<0.000000e+00> : vector<128xf32>
    %15 = vector.multi_reduction <add>, %14, %cst_7 [0] : vector<32x128xf32> to vector<128xf32>
    %16 = vector.shape_cast %15 : vector<128xf32> to vector<1x128xf32>
    %cst_8 = arith.constant 0.000000e+00 : f32
    %17 = vector.broadcast %cst_8 : f32 to vector<1x128xf32>
    %18 = arith.cmpf ogt, %16, %17 : vector<1x128xf32>
    %19 = math.rsqrt %16 : vector<1x128xf32>
    %cst_9 = arith.constant 0.000000e+00 : f32
    %20 = vector.broadcast %cst_9 : f32 to vector<1x128xf32>
    %21 = arith.select %18, %19, %20 : vector<1x128xi1>, vector<1x128xf32>
    %22 = vector.broadcast %13 : vector<8x1xf32> to vector<8x128xf32>
    %23 = arith.mulf %2, %22 : vector<8x128xf32>
    %24 = vector.broadcast %21 : vector<1x128xf32> to vector<8x128xf32>
    %25 = arith.mulf %23, %24 : vector<8x128xf32>
    %c0_10 = arith.constant 0 : index
    %c0_11 = arith.constant 0 : index
    %26 = vector.load %arg4[%c0_10, %c0_11] : memref<8x128xf32, #tpu.memory_space<vmem>>, vector<8x128xf32>
    tpu.vector_store %arg4[%c0_10, %c0_11], %25 {strides = array<i32>} : memref<8x128xf32, #tpu.memory_space<vmem>>, vector<8x128xf32>,
    return
  }
  func.func @transform_0(%arg0: i32) -> i32 {
    %c0_i32 = arith.constant 0 : i32
    %c0_i32_0 = arith.constant 0 : i32
    return %c0_i32 : i32
  }
  func.func @transform_1(%arg0: i32) -> (i32, i32) {
    %c0_i32 = arith.constant 0 : i32
    %c0_i32_0 = arith.constant 0 : i32
    %c0_i32_1 = arith.constant 0 : i32
    return %c0_i32, %c0_i32_0 : i32, i32
  }
  func.func @transform_2(%arg0: i32) -> (i32, i32) {
    %c0_i32 = arith.constant 0 : i32
    %c0_i32_0 = arith.constant 0 : i32
    return %c0_i32, %arg0 : i32, i32
  }
  func.func @transform_3(%arg0: i32) -> (i32, i32) {
    %c0_i32 = arith.constant 0 : i32
    %c0_i32_0 = arith.constant 0 : i32
    return %c0_i32, %arg0 : i32, i32
  }
}

</mosaic_0001>

<bundles_post_ra>
// kernel: _router_logits.1
= control target key start
LH: loop header
LB: loop body
LE: loop exit
PB: predicated region body
PF: predicated region fallthrough
CT: control target
= control target key end

     0   :  { %v157_v0 = vmov 0.0|0.0   ;;  %vm158_vm0 = vmmov 0   ;;  %v159_v4 = vmov 0.0   ;;  %vm20_vm1 = vcmask 261120   ;;  %s201_s2 = inlined_call_operand.vmem [shape: f32[32,128], index: 2, kind: input, shape index: {}]   ;;  %s202_s1 = inlined_call_operand.vmem [shape: f32[8,32], index: 1, kind: input, shape index: {}]   ;;  %s203_s0 = inlined_call_operand.<no memory space> [shape: f32[1], index: 0, kind: input, shape index: {}]   ;;  %s204_s3 = inlined_call_operand.vmem [shape: f32[8,128], index: 3, kind: output, shape index: {}]  }
   0x1   :  { %144 = vmatprep.subr.bf16.mxu0 %v157_v0  ;;  %v16_v1 = vld [vmem:[%s201_s2] sm:$0xff]  ;;  %v17_v2 = vld [vmem:[%s201_s2 + $0x8] sm:$0xff]  ;;  %v18_v3 = vld [vmem:[%s201_s2 + $0x10] sm:$0xff]  ;;  %141 = vmatprep.mubr.msk.f32.mxu0 %vm158_vm0, %v159_v4  ;;  %v102_v27 = vstv %s203_s0 }
   0x2   :  { %v145_v5 = vpack.c.bf16 %v17_v2, %v16_v1  ;;  %v104_v6 = vmul.f32 %v16_v1, %v16_v1  ;;  %v105_v7 = vmul.f32 %v17_v2, %v17_v2  ;;  %v19_v8 = vld [vmem:[%s201_s2 + $0x18] sm:$0xff]  ;;  %v106_v9 = vmul.f32 %v18_v3, %v18_v3  ;;  %v15_v10 = vld [vmem:[%s202_s1] sm:$0xff] }
   0x3   :  { %v94_v11 = vmul.f32 %v15_v10, %v15_v10  ;;  %v148_v13 = vpack.c.bf16 %v19_v8, %v18_v3  ;;  %v107_v14 = vmul.f32 %v19_v8, %v19_v8 }
   0x4   :  { %146 = vmatpush3.bf16.msra.mxu0 %v145_v5  ;;  %v108_v12 = vadd.f32 %v105_v7, %v104_v6 }
   0x5   :  { %147 = vmatprep.subr.bf16.mxu0 %v157_v0  ;;  %v95_v15 = vsel %vm20_vm1, %v94_v11, 0.0 }
   0x6   :  { %v109_v16 = vadd.f32 %v108_v12, %v106_v9  ;;  %96 = vadd.xlane.f32.xlu0 %v95_v15 }
   0x8   :  { %149 = vmatpush3.bf16.msra.mxu0 %v148_v13  ;;  %v110_v17 = vadd.f32 %v109_v16, %v107_v14 }
   0xa   :  { %v111_v18 = vrot.slane %v110_v17, 4 }
   0xb   :  { %142 = vmatmul.mubr.msk.f32.vlgmr.msra.gmra.mrb[0].mxu0 %vm20_vm1, %v15_v10 }
   0xc   :  { %v112_v19 = vadd.f32 %v111_v18, %v110_v17 }
   0xe   :  { %v113_v20 = vrot.slane %v112_v19, 2 }
  0x10   :  { %v114_v21 = vadd.f32 %v113_v20, %v112_v19 }
  0x12   :  { %v115_v22 = vrot.slane %v114_v21, 1 }
  0x14   :  { %v116_v24 = vadd.f32 %v115_v22, %v114_v21 }
  0x16   :  { %vm117_vm3 = vcmp.gt.f32.partialorder %v116_v24, 0.0 }
  0x93   :  { %v97_v23 = vpop.xlane.xlu0 %96 }
  0x94   :  { %153 = vrsqrt.f32 %v97_v23  ;;  %vm98_vm2 = vcmp.gt.f32.partialorder %v97_v23, 0.0 }
  0x95   :  { %155 = vrsqrt.f32 %v116_v24 }
  0x9e   :  { %v154_v25 = vpop.eup %153 }
  0x9f   :  { %v100_v26 = vsel %vm98_vm2, %v154_v25, 0.0  ;;  %v156_v28 = vpop.eup %155 }
  0xa0   :  { %v103_v29 = vmul.f32 %v102_v27, %v100_v26  ;;  %v119_v31 = vsel %vm117_vm3, %v156_v28, 0.0 }
  0xde   :  { %v90_v30 = vpop.f32.mrb[0].mxu0 }
  0xdf   :  { %v120_v32 = vmul.f32 %v103_v29, %v90_v30  ;;  %v143_v33 = vpop.f32.mrb[1].mxu0 }
  0xe1   :  { %v121_v34 = vmul.f32 %v120_v32, %v119_v31 }
  0xe3   :  { %122 = vst [vmem:[%s204_s3] sm:$0xff] %v121_v34 }

</bundles_post_ra>
